<compile_context>
chip_gen: v7x
topology: tpu7x:2x2x1
jax: 0.10.0
libtpu: 0.0.40
codegen_flags: <defaults>
</compile_context>

<pallas_src>
import jax
import jax.numpy as jnp
from jax.experimental import pallas as pl
from jax.experimental.pallas import tpu as pltpu

EPS = 1e-5
IN_FEATURES = 21 * 2        # 42
OUT_FEATURES = 100
OUT_PAD = 128               # lane-dense padded output width
VMEM_LIMIT_BYTES = 48 << 20  # safe on v5e/v6e (128 MiB) and v7x (64 MiB)
TILE_VMEM_BUDGET = 24 << 20  # budget for per-step tiles + intermediates


def _round_up(n, m):
    return ((n + m - 1) // m) * m


# --------------------------------------------------------------------------
# Kernel: one row-block of the batch per grid step.
# --------------------------------------------------------------------------
def _dots_kernel(x_ref, w1_ref, b1_ref, w2_ref, b2_ref, o_ref):
    # In-kernel cast of x to the matmul dtype (no-op for f32).
    x = x_ref[...].astype(w1_ref.dtype)
    # fc1 (+ folded bn1) -> ReLU, accumulate in f32.
    h = jnp.dot(x, w1_ref[...], preferred_element_type=jnp.float32) + b1_ref[...]
    h = jnp.maximum(h, 0.0)
    # Dropout is identity in eval mode.
    # fc2 (+ folded bn2) -> ReLU.
    y = jnp.dot(h.astype(w2_ref.dtype), w2_ref[...],
                preferred_element_type=jnp.float32) + b2_ref[...]
    o_ref[...] = jnp.maximum(y, 0.0).astype(o_ref.dtype)


# --------------------------------------------------------------------------
# Parameter construction (PyTorch-shaped) and BN-folding / padding prep.
# --------------------------------------------------------------------------
def init_params(n_hidden_neurons, key):
    """Raw parameters with the same shapes/init style as the PyTorch module."""
    ks = jax.random.split(key, 4)
    bound1 = 1.0 / jnp.sqrt(IN_FEATURES)
    bound2 = 1.0 / jnp.sqrt(n_hidden_neurons)
    return dict(
        # fc1: PyTorch weight (H, 42), bias (H,)
        w1=jax.random.uniform(ks[0], (n_hidden_neurons, IN_FEATURES),
                              jnp.float32, -bound1, bound1),
        b1=jax.random.uniform(ks[1], (n_hidden_neurons,), jnp.float32,
                              -bound1, bound1),
        g1=jnp.ones((n_hidden_neurons,), jnp.float32),
        be1=jnp.zeros((n_hidden_neurons,), jnp.float32),
        m1=jnp.zeros((n_hidden_neurons,), jnp.float32),
        v1=jnp.ones((n_hidden_neurons,), jnp.float32),
        # fc2: PyTorch weight (100, H), bias (100,)
        w2=jax.random.uniform(ks[2], (OUT_FEATURES, n_hidden_neurons),
                              jnp.float32, -bound2, bound2),
        b2=jax.random.uniform(ks[3], (OUT_FEATURES,), jnp.float32,
                              -bound2, bound2),
        g2=jnp.ones((OUT_FEATURES,), jnp.float32),
        be2=jnp.zeros((OUT_FEATURES,), jnp.float32),
        m2=jnp.zeros((OUT_FEATURES,), jnp.float32),
        v2=jnp.ones((OUT_FEATURES,), jnp.float32),
    )


def prepare_params(params, matmul_dtype=jnp.float32):
    """Fold inference BatchNorm into the linear layers and pad to lane-dense
    shapes.  Do this ONCE, not per forward call.

    matmul_dtype=jnp.bfloat16 halves weight residency / x-tile DMA bytes and
    matches the native MXU datapath on v6e/v7x (also fine on v5e's MXU)."""
    H = params["w1"].shape[0]
    H_pad = max(128, _round_up(H, 128))

    # ---- layer 1 fold: y = (x@W1^T + b1 - m1)*scale1 + be1 ----
    scale1 = params["g1"] / jnp.sqrt(params["v1"] + EPS)          # (H,)
    w1f = params["w1"].T * scale1[None, :]                        # (42, H)
    b1f = (params["b1"] - params["m1"]) * scale1 + params["be1"]  # (H,)

    # ---- layer 2 fold ----
    scale2 = params["g2"] / jnp.sqrt(params["v2"] + EPS)          # (100,)
    w2f = params["w2"].T * scale2[None, :]                        # (H, 100)
    b2f = (params["b2"] - params["m2"]) * scale2 + params["be2"]  # (100,)

    # ---- zero-pad hidden -> H_pad and output -> 128 (exact zeros survive
    #      bias+ReLU, so sliced results are unchanged) ----
    w1p = jnp.zeros((IN_FEATURES, H_pad), jnp.float32).at[:, :H].set(w1f)
    b1p = jnp.zeros((1, H_pad), jnp.float32).at[:, :H].set(b1f)
    w2p = jnp.zeros((H_pad, OUT_PAD), jnp.float32).at[:H, :OUT_FEATURES].set(w2f)
    b2p = jnp.zeros((1, OUT_PAD), jnp.float32).at[:, :OUT_FEATURES].set(b2f)

    return dict(
        w1=w1p.astype(matmul_dtype),
        b1=b1p,                       # biases stay f32 (added post-matmul)
        w2=w2p.astype(matmul_dtype),
        b2=b2p,
        h_pad=H_pad,
        matmul_dtype=matmul_dtype,
    )


# --------------------------------------------------------------------------
# VMEM-aware batch-tile selection (works for v5e/v6e 128 MiB and v7x 64 MiB).
# --------------------------------------------------------------------------
def _pick_tb(B, H_pad, mm_bytes, out_bytes, budget=TILE_VMEM_BUDGET):
    per_row = (2 * IN_FEATURES * 4          # double-buffered x tile (f32 in HBM)
               + 2 * OUT_PAD * out_bytes    # double-buffered out tile
               + IN_FEATURES * mm_bytes     # in-kernel cast copy of x
               + H_pad * 4                  # h intermediate (f32)
               + OUT_PAD * 4)               # y intermediate (f32)
    weights = 2 * ((IN_FEATURES + OUT_PAD) * H_pad * mm_bytes
                   + (H_pad + OUT_PAD) * 4)
    avail = max(budget - weights, 1 << 20)
    tb = (avail // per_row) // 8 * 8
    tb = int(min(tb, 8192, _round_up(B, 8)))
    return max(8, tb)


# --------------------------------------------------------------------------
# Forward wrapper.
# --------------------------------------------------------------------------
def dots_gesture_forward(x, prepared, *, out_dtype=jnp.float32,
                         return_padded=False):
    """x: (B, 21, 2) float32 -> (B, 100) out_dtype.

    return_padded=True returns the lane-dense (B, 128) buffer directly so a
    fused consumer can avoid an extra HBM pass for the slice."""
    B = x.shape[0]
    H_pad = prepared["h_pad"]
    mm_dtype = prepared["matmul_dtype"]
    mm_bytes = jnp.dtype(mm_dtype).itemsize
    out_bytes = jnp.dtype(out_dtype).itemsize

    # x stays f32; the matmul-dtype cast happens inside the kernel.
    xf = x.reshape(B, -1)                               # (B, 42) like x.view(B,-1)

    TB = _pick_tb(B, H_pad, mm_bytes, out_bytes)
    grid = (pl.cdiv(B, TB),)                            # tail block masked by Pallas

    w1, b1, w2, b2 = prepared["w1"], prepared["b1"], prepared["w2"], prepared["b2"]

    in_specs = [
        pl.BlockSpec((TB, IN_FEATURES), lambda i: (i, 0)),   # x: blocked on rows
        pl.BlockSpec(w1.shape, lambda i: (0, 0)),            # weights resident
        pl.BlockSpec(b1.shape, lambda i: (0, 0)),
        pl.BlockSpec(w2.shape, lambda i: (0, 0)),
        pl.BlockSpec(b2.shape, lambda i: (0, 0)),
    ]
    out_spec = pl.BlockSpec((TB, OUT_PAD), lambda i: (i, 0))
    out_shape = jax.ShapeDtypeStruct((B, OUT_PAD), out_dtype)

    flops = 2 * B * (IN_FEATURES * H_pad + H_pad * OUT_PAD)
    bytes_accessed = (B * IN_FEATURES * 4 + B * OUT_PAD * out_bytes
                      + (IN_FEATURES + OUT_PAD) * H_pad * mm_bytes
                      + (H_pad + OUT_PAD) * 4)

    out = pl.pallas_call(
        _dots_kernel,
        out_shape=out_shape,
        grid=grid,
        in_specs=in_specs,
        out_specs=out_spec,
        compiler_params=pltpu.CompilerParams(
            dimension_semantics=("parallel",),      # shards row-blocks across TCs
            vmem_limit_bytes=VMEM_LIMIT_BYTES),
        cost_estimate=pl.CostEstimate(flops=flops, transcendentals=0,
                                      bytes_accessed=bytes_accessed),
    )(xf, w1, b1, w2, b2)

    if return_padded:
        return out                       # (B, 128), cols 100..127 exactly zero
    return out[:, :OUT_FEATURES]         # (B, 100)


# --------------------------------------------------------------------------
# Plain-JAX reference of the (inference-mode) PyTorch forward.
# --------------------------------------------------------------------------
def _reference_forward(x, params):
    B = x.shape[0]
    h = x.reshape(B, -1) @ params["w1"].T + params["b1"]
    h = (h - params["m1"]) * (params["g1"] / jnp.sqrt(params["v1"] + EPS)) + params["be1"]
    h = jnp.maximum(h, 0.0)
    y = h @ params["w2"].T + params["b2"]
    y = (y - params["m2"]) * (params["g2"] / jnp.sqrt(params["v2"] + EPS)) + params["be2"]
    return jnp.maximum(y, 0.0)


if __name__ == "__main__":
    key = jax.random.PRNGKey(0)
    k_x, k_x2, k_p = jax.random.split(key, 3)

    n_hidden_neurons = 32
    params = init_params(n_hidden_neurons, k_p)

    # ---- f32 path, exact check ----
    B = 8
    x = jax.random.normal(k_x, (B, 21, 2), dtype=jnp.float32)
    prepared_f32 = prepare_params(params, matmul_dtype=jnp.float32)
    out = jax.block_until_ready(dots_gesture_forward(x, prepared_f32))
    ref = _reference_forward(x, params)
    assert out.shape == (B, OUT_FEATURES), out.shape
    assert jnp.allclose(out, ref, atol=1e-5, rtol=1e-5), "f32 mismatch vs reference"

    # ---- ragged batch (exercises the masked tail block of the cdiv grid) ----
    B2 = 13
    x2 = jax.random.normal(k_x2, (B2, 21, 2), dtype=jnp.float32)
    out2 = jax.block_until_ready(dots_gesture_forward(x2, prepared_f32))
    ref2 = _reference_forward(x2, params)
    assert out2.shape == (B2, OUT_FEATURES), out2.shape
    assert jnp.allclose(out2, ref2, atol=1e-5, rtol=1e-5), "tail-block mismatch"

    # ---- bf16-weight path (halved weight/x-tile traffic), loose tolerance ----
    prepared_bf16 = prepare_params(params, matmul_dtype=jnp.bfloat16)
    out_bf16 = jax.block_until_ready(dots_gesture_forward(x, prepared_bf16))
    assert out_bf16.shape == (B, OUT_FEATURES)
    assert float(jnp.max(jnp.abs(out_bf16 - ref))) < 0.1, "bf16 path diverged"

    print("KERNEL_OK")
</pallas_src>

<mosaic_0001>
module attributes {stable_mosaic.version = 11 : i64} {
  func.func @_dots_kernel(%arg0: i32, %arg1: memref<8x42xf32, #tpu.memory_space<vmem>>, %arg2: memref<42x128xf32, #tpu.memory_space<vmem>>, %arg3: memref<1x128xf32, #tpu.memory_space<vmem>>, %arg4: memref<128x128xf32, #tpu.memory_space<vmem>>, %arg5: memref<1x128xf32, #tpu.memory_space<vmem>>, %arg6: memref<8x128xf32, #tpu.memory_space<vmem>>) attributes {dimension_semantics = [#tpu.dimension_semantics<parallel>], iteration_bounds = array<i64: 1>, scalar_prefetch = 0 : i64, scratch_operands = 0 : i64, tpu.core_type = #tpu.core_type<tc>, window_params = [{transform_indices = @transform_0, window_bounds = array<i64: 8, 42>}, {pipeline_mode = #tpu.pipeline_mode<synchronous>, transform_indices = @transform_1, window_bounds = array<i64: 42, 128>}, {pipeline_mode = #tpu.pipeline_mode<synchronous>, transform_indices = @transform_2, window_bounds = array<i64: 1, 128>}, {pipeline_mode = #tpu.pipeline_mode<synchronous>, transform_indices = @transform_3, window_bounds = array<i64: 128, 128>}, {pipeline_mode = #tpu.pipeline_mode<synchronous>, transform_indices = @transform_4, window_bounds = array<i64: 1, 128>}, {transform_indices = @transform_5, window_bounds = array<i64: 8, 128>}]} {
    %c0 = arith.constant 0 : index
    %c0_0 = arith.constant 0 : index
    %0 = vector.load %arg1[%c0, %c0_0] : memref<8x42xf32, #tpu.memory_space<vmem>>, vector<8x42xf32>
    %c0_1 = arith.constant 0 : index
    %c0_2 = arith.constant 0 : index
    %1 = vector.load %arg2[%c0_1, %c0_2] : memref<42x128xf32, #tpu.memory_space<vmem>>, vector<42x128xf32>
    %cst = arith.constant dense<0.000000e+00> : vector<8x128xf32>
    %2 = tpu.matmul %0, %1, %cst {dimension_numbers = #tpu.dot_dimension_numbers<[1], [0], [0], [1], [0, 0, 1, 1], [], []>} : vector<8x42xf32>, vector<42x128xf32>, vector<8x128xf32> -> vector<8x128xf32>
    %c0_3 = arith.constant 0 : index
    %c0_4 = arith.constant 0 : index
    %3 = vector.load %arg3[%c0_3, %c0_4] : memref<1x128xf32, #tpu.memory_space<vmem>>, vector<1x128xf32>
    %4 = vector.broadcast %3 : vector<1x128xf32> to vector<8x128xf32>
    %5 = arith.addf %2, %4 : vector<8x128xf32>
    %cst_5 = arith.constant 0.000000e+00 : f32
    %6 = vector.broadcast %cst_5 : f32 to vector<8x128xf32>
    %7 = arith.maximumf %5, %6 : vector<8x128xf32>
    %c0_6 = arith.constant 0 : index
    %c0_7 = arith.constant 0 : index
    %8 = vector.load %arg4[%c0_6, %c0_7] : memref<128x128xf32, #tpu.memory_space<vmem>>, vector<128x128xf32>
    %cst_8 = arith.constant dense<0.000000e+00> : vector<8x128xf32>
    %9 = tpu.matmul %7, %8, %cst_8 {dimension_numbers = #tpu.dot_dimension_numbers<[1], [0], [0], [1], [0, 0, 1, 1], [], []>} : vector<8x128xf32>, vector<128x128xf32>, vector<8x128xf32> -> vector<8x128xf32>
    %c0_9 = arith.constant 0 : index
    %c0_10 = arith.constant 0 : index
    %10 = vector.load %arg5[%c0_9, %c0_10] : memref<1x128xf32, #tpu.memory_space<vmem>>, vector<1x128xf32>
    %11 = vector.broadcast %10 : vector<1x128xf32> to vector<8x128xf32>
    %12 = arith.addf %9, %11 : vector<8x128xf32>
    %cst_11 = arith.constant 0.000000e+00 : f32
    %13 = vector.broadcast %cst_11 : f32 to vector<8x128xf32>
    %14 = arith.maximumf %12, %13 : vector<8x128xf32>
    %c0_12 = arith.constant 0 : index
    %c0_13 = arith.constant 0 : index
    %15 = vector.load %arg6[%c0_12, %c0_13] : memref<8x128xf32, #tpu.memory_space<vmem>>, vector<8x128xf32>
    tpu.vector_store %arg6[%c0_12, %c0_13], %14 {strides = array<i32>} : memref<8x128xf32, #tpu.memory_space<vmem>>, vector<8x128xf32>,
    return
  }
  func.func @transform_0(%arg0: i32) -> (i32, i32) {
    %c0_i32 = arith.constant 0 : i32
    %c0_i32_0 = arith.constant 0 : i32
    return %arg0, %c0_i32 : i32, i32
  }
  func.func @transform_1(%arg0: i32) -> (i32, i32) {
    %c0_i32 = arith.constant 0 : i32
    %c0_i32_0 = arith.constant 0 : i32
    %c0_i32_1 = arith.constant 0 : i32
    return %c0_i32, %c0_i32_0 : i32, i32
  }
  func.func @transform_2(%arg0: i32) -> (i32, i32) {
    %c0_i32 = arith.constant 0 : i32
    %c0_i32_0 = arith.constant 0 : i32
    %c0_i32_1 = arith.constant 0 : i32
    return %c0_i32, %c0_i32_0 : i32, i32
  }
  func.func @transform_3(%arg0: i32) -> (i32, i32) {
    %c0_i32 = arith.constant 0 : i32
    %c0_i32_0 = arith.constant 0 : i32
    %c0_i32_1 = arith.constant 0 : i32
    return %c0_i32, %c0_i32_0 : i32, i32
  }
  func.func @transform_4(%arg0: i32) -> (i32, i32) {
    %c0_i32 = arith.constant 0 : i32
    %c0_i32_0 = arith.constant 0 : i32
    %c0_i32_1 = arith.constant 0 : i32
    return %c0_i32, %c0_i32_0 : i32, i32
  }
  func.func @transform_5(%arg0: i32) -> (i32, i32) {
    %c0_i32 = arith.constant 0 : i32
    %c0_i32_0 = arith.constant 0 : i32
    return %arg0, %c0_i32 : i32, i32
  }
}

</mosaic_0001>

<bundles_post_ra>
// kernel: tpu_custom_call.1
= control target key start
LH: loop header
LB: loop body
LE: loop exit
PB: predicated region body
PF: predicated region fallthrough
CT: control target
= control target key end

     0   :  { %10 = vsyncpa [#allocation3], 0  ;;  %s580_s0 = inlined_call_operand.hbm [shape: f32[8,42], index: 0, kind: input, shape index: {}]   ;;  %s581_s1 = inlined_call_operand.hbm [shape: f32[42,128], index: 1, kind: input, shape index: {}]   ;;  %s582_s2 = inlined_call_operand.vmem [shape: f32[1,128], index: 2, kind: input, shape index: {}]   ;;  %s583_s3 = inlined_call_operand.hbm [shape: f32[128,128], index: 3, kind: input, shape index: {}]   ;;  %s584_s4 = inlined_call_operand.vmem [shape: f32[1,128], index: 4, kind: input, shape index: {}]   ;;  %s585_s5 = inlined_call_operand.hbm [shape: f32[8,128], index: 5, kind: output, shape index: {}]  }
   0x1   :  { %11 = vsyncpa [#allocation6], 0 }
   0x2   :  { %12 = vsyncpa [#allocation4], 0  ;;  %s480_s18 = smov [#allocation5]   ;;  %s386_s22 = scalar_lea.hbm %s581_s1, 768 }
   0x3   :  { %s28_s19 = sshll.u32 %s480_s18, 4  ;;  %p387_p0 = scmp.ne.s32.totalorder %s581_s1, %s386_s22  ;;  %s29_s19 = int_to_ptr.vmem [resolvable:$true] %s28_s19 }
   0x4   :  { %p390_p1 = scmp.lt.u32.totalorder %s386_s22, %s581_s1 }
   0x6   :  { %p392_p2 = pnand %p390_p1, %p387_p0 }
   0x8   :  { %395 = shalt.err (!%p392_p2)
}
   0x9   :  { %s396_s27 = scalar_lea.vmem %s29_s19, 768  ;;  %p401_p4 = scmp.lt.s32.totalorder %s29_s19, %s29_s19 }
   0xa   :  { %p397_p3 = scmp.ne.s32.totalorder %s29_s19, %s396_s27  ;;  %p402_p5 = scmp.lt.s32.totalorder %s396_s27, %s396_s27 }
   0xc   :  { %p403_p6 = por %p402_p5, %p401_p4 }
   0xe   :  { %p404_p7 = pnand %p403_p6, %p397_p3 }
  0x10   :  { %407 = shalt.err (!%p404_p7)
}
  0x11   :  { %s481_s28 = smov 128   ;;  %s482_s29 = smov 8  }
  0x12   :  { %34 = dma.hbm_to_vmem [thread:$0]  %s581_s1, 768, %s29_s19, [#allocation6], %s481_s28, %s481_s28, %s482_s29  }
  0x13   :  { %s483_s7 = smov [#allocation2]   ;;  %s484_s9 = smov [#allocation7]  }
  0x14   :  { %s19_s8 = sshll.u32 %s483_s7, 4  ;;  %s42_s10 = sshll.u32 %s484_s9, 4  ;;  %s20_s8 = int_to_ptr.vmem [resolvable:$true] %s19_s8  ;;  %s43_s10 = int_to_ptr.vmem [resolvable:$true] %s42_s10 }
  0x15   :  { %s408_s13 = scalar_lea.hbm %s580_s0, 128 }
  0x16   :  { %p409_p8 = scmp.ne.s32.totalorder %s580_s0, %s408_s13  ;;  %p412_p9 = scmp.lt.u32.totalorder %s408_s13, %s580_s0 }
  0x18   :  { %p414_p10 = pnand %p412_p9, %p409_p8 }
  0x1a   :  { %417 = shalt.err (!%p414_p10)
}
  0x1b   :  { %s418_s1 = scalar_lea.vmem %s20_s8, 128  ;;  %p423_p12 = scmp.lt.s32.totalorder %s20_s8, %s20_s8 }
  0x1c   :  { %p419_p11 = scmp.ne.s32.totalorder %s20_s8, %s418_s1  ;;  %p424_p13 = scmp.lt.s32.totalorder %s418_s1, %s418_s1 }
  0x1e   :  { %p425_p0 = por %p424_p13, %p423_p12 }
  0x20   :  { %p426_p1 = pnand %p425_p0, %p419_p11 }
  0x22   :  { %429 = shalt.err (!%p426_p1)
}
  0x23   :  { %22 = dma.hbm_to_vmem [thread:$0]  %s580_s0, 128, %s20_s8, [#allocation3]  }
  0x24   :  { %s430_s22 = scalar_lea.hbm %s583_s3, 2048 }
  0x25   :  { %p431_p2 = scmp.ne.s32.totalorder %s583_s3, %s430_s22  ;;  %p434_p3 = scmp.lt.u32.totalorder %s430_s22, %s583_s3 }
  0x27   :  { %p436_p4 = pnand %p434_p3, %p431_p2 }
  0x29   :  { %439 = shalt.err (!%p436_p4)
}
  0x2a   :  { %s440_s27 = scalar_lea.vmem %s43_s10, 2048  ;;  %p445_p6 = scmp.lt.s32.totalorder %s43_s10, %s43_s10 }
  0x2b   :  { %p441_p5 = scmp.ne.s32.totalorder %s43_s10, %s440_s27  ;;  %p446_p7 = scmp.lt.s32.totalorder %s440_s27, %s440_s27 }
  0x2d   :  { %p447_p8 = por %p446_p7, %p445_p6 }
  0x2f   :  { %p448_p9 = pnand %p447_p8, %p441_p5 }
  0x31   :  { %451 = shalt.err (!%p448_p9)
}
  0x32   :  { %48 = dma.hbm_to_vmem [thread:$0]  %s583_s3, 2048, %s43_s10, [#allocation6], %s481_s28, %s481_s28, %s482_s29  }
  0x33   :  { %474 = dma.done.wait [#allocation3], 128  }
  0x34   :  { %475 = vsyncadd [#allocation3], 4294967168 }
  0x35   :  { %476 = dma.done.wait [#allocation6], 2816  }
  0x36   :  { %477 = vsyncadd [#allocation6], 4294964480  ;;  %v485_v0 = vmov 0.0|0.0   ;;  %vm486_vm0 = vmmov 0   ;;  %v487_v1 = vmov 0.0   ;;  %v61_v2 = vld [vmem:[#allocation5] sm:$0xff] }
  0x37   :  { %342 = vmatprep.subr.bf16.mxu0 %v485_v0  ;;  %352 = vmatprep.subr.bf16.mxu1 %v485_v0  ;;  %v62_v3 = vld [vmem:[#allocation5 + $0x8] sm:$0xff]  ;;  %v63_v4 = vld [vmem:[#allocation5 + $0x10] sm:$0xff]  ;;  %v64_v6 = vld [vmem:[#allocation5 + $0x18] sm:$0xff]  ;;  %vm78_vm1 = vcmask 1041408   ;;  %vm488_vm2 = vmmov 1   ;;  %vm74_vm4 = vcmask 343040  }
  0x38   :  { %304 = vmatprep.mubr.msk.f32.mxu0 %vm486_vm0, %v487_v1  ;;  %339 = vmatprep.mubr.msk.f32.mxu1 %vm486_vm0, %v487_v1  ;;  %v343_v5 = vpack.c.bf16 %v62_v3, %v61_v2  ;;  %v153_v7 = vld [vmem:[#allocation7] sm:$0xff]  ;;  %v154_v8 = vld [vmem:[#allocation7 + $0x8] sm:$0xff]  ;;  %v346_v9 = vpack.c.bf16 %v64_v6, %v63_v4  ;;  %v155_v11 = vld [vmem:[#allocation7 + $0x10] sm:$0xff]  ;;  %s489_s7 = smov [#allocation8]  }
  0x39   :  { %v353_v10 = vpack.c.bf16 %v154_v8, %v153_v7  ;;  %v156_v12 = vld [vmem:[#allocation7 + $0x18] sm:$0xff]  ;;  %v65_v13 = vld [vmem:[#allocation5 + $0x20] sm:$0xff]  ;;  %v157_v16 = vld [vmem:[#allocation7 + $0x20] sm:$0xff]  ;;  %s254_s8 = sshll.u32 %s489_s7, 4  ;;  %s255_s8 = int_to_ptr.vmem [resolvable:$true] %s254_s8 }
  0x3a   :  { %344 = vmatpush3.bf16.msra.mxu0 %v343_v5  ;;  %v66_v14 = vld [vmem:[#allocation5 + $0x28] sm:$0x3]  ;;  %v356_v15 = vpack.c.bf16 %v156_v12, %v155_v11  ;;  %v158_v17 = vld [vmem:[#allocation7 + $0x28] sm:$0xff]  ;;  %vm350_vm3 = vmpackc.low %vm78_vm1, %vm488_vm2  ;;  %s452_s9 = scalar_lea.vmem %s255_s8, 128  ;;  %p457_p11 = scmp.lt.s32.totalorder %s255_s8, %s255_s8 }
  0x3b   :  { %345 = vmatprep.subr.bf16.mxu0 %v485_v0  ;;  %354 = vmatpush3.bf16.msra.mxu1 %v353_v10  ;;  %v349_v18 = vpack.c.bf16 %v66_v14, %v65_v13  ;;  %v359_v19 = vpack.c.bf16 %v158_v17, %v157_v16  ;;  %v159_v20 = vld [vmem:[#allocation7 + $0x30] sm:$0xff]  ;;  %v160_v21 = vld [vmem:[#allocation7 + $0x38] sm:$0xff]  ;;  %v60_v22 = vld [vmem:[#allocation2] sm:$0xff]  ;;  %p453_p10 = scmp.ne.s32.totalorder %s255_s8, %s452_s9  ;;  %p458_p12 = scmp.lt.s32.totalorder %s452_s9, %s452_s9 }
  0x3c   :  { %355 = vmatprep.subr.bf16.mxu1 %v485_v0  ;;  %v362_v23 = vpack.c.bf16 %v160_v21, %v159_v20  ;;  %v161_v24 = vld [vmem:[#allocation7 + $0x40] sm:$0xff]  ;;  %v162_v25 = vld [vmem:[#allocation7 + $0x48] sm:$0xff]  ;;  %v163_v27 = vld [vmem:[#allocation7 + $0x50] sm:$0xff] }
  0x3d   :  { %v365_v26 = vpack.c.bf16 %v162_v25, %v161_v24  ;;  %v164_v28 = vld [vmem:[#allocation7 + $0x58] sm:$0xff]  ;;  %v165_v30 = vld [vmem:[#allocation7 + $0x60] sm:$0xff]  ;;  %v166_v31 = vld [vmem:[#allocation7 + $0x68] sm:$0xff]  ;;  %p459_p13 = por %p458_p12, %p457_p11 }
  0x3e   :  { %347 = vmatpush3.bf16.msra.mxu0 %v346_v9  ;;  %v368_v29 = vpack.c.bf16 %v164_v28, %v163_v27  ;;  %v371_v32 = vpack.c.bf16 %v166_v31, %v165_v30  ;;  %v167_v33 = vld [vmem:[#allocation7 + $0x70] sm:$0xff]  ;;  %v168_v34 = vld [vmem:[#allocation7 + $0x78] sm:$0xff]  ;;  %v264_v36 = vld [vmem:[%s582_s2] ss:$0 sm:$0xff] }
  0x3f   :  { %348 = vmatprep.subr.bf16.mxu0 %v485_v0  ;;  %357 = vmatpush3.bf16.msra.mxu1 %v356_v15  ;;  %v374_v35 = vpack.c.bf16 %v168_v34, %v167_v33  ;;  %v267_v41 = vld [vmem:[%s584_s4] ss:$0 sm:$0xff]  ;;  %p460_p0 = pnand %p459_p13, %p453_p10 }
  0x40   :  { %358 = vmatprep.subr.bf16.mxu1 %v485_v0 }
  0x42   :  { %351 = vmatpush3.bf16.msk.msra.mxu0 %vm350_vm3, %v349_v18 }
  0x43   :  { %360 = vmatpush3.bf16.msra.mxu1 %v359_v19 }
  0x44   :  { %361 = vmatprep.subr.bf16.mxu1 %v485_v0 }
  0x45   :  { %305 = vmatmul.mubr.msk.f32.vlgmr.msra.gmra.mrb[0].mxu0 %vm74_vm4, %v60_v22 }
  0x47   :  { %363 = vmatpush3.bf16.msra.mxu1 %v362_v23 }
  0x48   :  { %364 = vmatprep.subr.bf16.mxu1 %v485_v0 }
  0x4b   :  { %366 = vmatpush3.bf16.msra.mxu1 %v365_v26 }
  0x4c   :  { %367 = vmatprep.subr.bf16.mxu1 %v485_v0 }
  0x4f   :  { %369 = vmatpush3.bf16.msra.mxu1 %v368_v29 }
  0x50   :  { %370 = vmatprep.subr.bf16.mxu1 %v485_v0 }
  0x53   :  { %372 = vmatpush3.bf16.msra.mxu1 %v371_v32 }
  0x54   :  { %373 = vmatprep.subr.bf16.mxu1 %v485_v0 }
  0x57   :  { %375 = vmatpush3.bf16.msra.mxu1 %v374_v35 }
 0x118   :  { %v148_v37 = vpop.f32.mrb[0].mxu0 }
 0x119   :  { %v149_v38 = vadd.f32 %v264_v36, %v148_v37  ;;  %v306_v39 = vpop.f32.mrb[1].mxu0 }
 0x11b   :  { %v152_v40 = vmax.f32 %v149_v38, 0.0 }
 0x11d   :  { %340 = vmatmul.mubr.f32.vlgmr.msra.gmra.mrb[0].mxu1 %v152_v40 }
 0x1f0   :  { %v242_v42 = vpop.f32.mrb[0].mxu1 }
 0x1f1   :  { %v243_v43 = vadd.f32 %v267_v41, %v242_v42  ;;  %v341_v44 = vpop.f32.mrb[1].mxu1 }
 0x1f3   :  { %v246_v45 = vmax.f32 %v243_v43, 0.0 }
 0x1f5   :  { %247 = vst [vmem:[#allocation8] sm:$0xff] %v246_v45 }
 0x1f6   :  { %463 = shalt.err (!%p460_p0)
}
 0x1f7   :  { %s464_s11 = scalar_lea.hbm %s585_s5, 128 }
 0x1f8   :  { %p465_p1 = scmp.ne.s32.totalorder %s585_s5, %s464_s11  ;;  %p468_p2 = scmp.lt.u32.totalorder %s464_s11, %s585_s5 }
 0x1fa   :  { %p470_p3 = pnand %p468_p2, %p465_p1 }
 0x1fc   :  { %473 = shalt.err (!%p470_p3)
}
 0x1fd   :  { %257 = dma.vmem_to_hbm [thread:$0]  %s255_s8, 128, %s585_s5, [#allocation4]  }
 0x1fe   :  { %478 = dma.done.wait [#allocation4], 128  }
 0x1ff   :  { %479 = vsyncadd [#allocation4], 4294967168 }
 0x200   :  { %261 = vsyncpa [#allocation3], 1 }
 0x201   :  { %262 = vsyncpa [#allocation6], 1 }
 0x202   :  { %263 = vsyncpa [#allocation4], 1 }

</bundles_post_ra>
